<compile_context>
chip_gen: v7x
topology: tpu7x:2x2x1
jax: 0.10.0
libtpu: 0.0.40
codegen_flags: <defaults>
</compile_context>

<pallas_src>
import functools
import math

import jax
import jax.numpy as jnp
import numpy as np
from jax import lax
from jax.experimental import pallas as pl
from jax.experimental.pallas import tpu as pltpu

_EPS_NORM = 1e-12  # torch F.normalize eps


def _gumble_softmax_v2_kernel(x_ref, wn_ref, o_ref, *, n_valid, exact_st):
    """One tile of rows: row-normalize, matmul with pre-normalized/pre-scaled
    Wn, mask padded columns, hard one-hot (optionally exact straight-through)."""
    x = x_ref[...].astype(jnp.float32)                      # (TM, Kp)

    # F.normalize(logits, dim=-1): x * rsqrt(max(sum(x^2), eps^2))
    #   == x / max(||x||_2, eps), rsqrt runs on the EUP slot.
    ss = jnp.sum(x * x, axis=-1, keepdims=True)
    xn = x * lax.rsqrt(jnp.maximum(ss, _EPS_NORM * _EPS_NORM))

    # MXU matmul.  Wn is already column-normalized and pre-scaled by s/tau in
    # the wrapper; its dtype decides the MXU operand precision.
    z = jnp.dot(xn.astype(wn_ref.dtype), wn_ref[...],
                preferred_element_type=jnp.float32)         # (TM, Np)

    # Mask padded class columns so they never win the max / feed the softmax.
    col = lax.broadcasted_iota(jnp.int32, z.shape, 1)
    z = jnp.where(col < n_valid, z, -jnp.inf)

    # Hard one-hot at argmax (first maximal index, matching torch.max tiebreak).
    m = jnp.max(z, axis=-1, keepdims=True)
    idx = jnp.min(jnp.where(z == m, col, z.shape[-1]), axis=-1, keepdims=True)
    y_hard = (col == idx).astype(jnp.float32)

    if exact_st:
        # Bit-faithful straight-through arithmetic (softmax is monotone, so the
        # argmax above is the same index torch picks from y_soft).
        e = jnp.exp(z - m)
        inv = pl.reciprocal(jnp.sum(e, axis=-1, keepdims=True), approx=True)
        y_soft = e * inv
        o_ref[...] = (y_hard - y_soft) + y_soft
    else:
        # Eval forward value is numerically y_hard; skip exp / reduce / divide.
        o_ref[...] = y_hard


def _round_up(x, m):
    return (x + m - 1) // m * m


def gumble_softmax_v2_forward(logits, W, s, *, tau=1.0, row_tile=512,
                              exact_st=False, matmul_dtype=jnp.float32):
    """logits: (B, C, K) float; W: (K, N) float; s: python float scalar."""
    B, C, K = logits.shape
    Kw, Nout = W.shape
    assert K == Kw, "logits last dim must match W rows"
    rows = B * C

    # One-time (grid-invariant) work, hoisted out of the kernel:
    #   F.normalize(W, dim=0) and the fold of (s / tau) into Wn.
    col_ss = jnp.sum(W.astype(jnp.float32) ** 2, axis=0, keepdims=True)
    wn = W.astype(jnp.float32) / jnp.maximum(jnp.sqrt(col_ss), _EPS_NORM)
    wn = (wn * (float(s) / float(tau))).astype(matmul_dtype)

    # Lane-dense padding of the class axes; row padding to the row tile.
    Kp = _round_up(K, 128)
    Np = _round_up(Nout, 128)
    rt = min(_round_up(row_tile, 8), _round_up(rows, 8))
    rows_p = _round_up(rows, rt)

    x2 = logits.reshape(rows, K).astype(jnp.float32)
    x2 = jnp.pad(x2, ((0, rows_p - rows), (0, Kp - K)))
    wn = jnp.pad(wn, ((0, Kp - K), (0, Np - Nout)))

    kernel = functools.partial(_gumble_softmax_v2_kernel,
                               n_valid=Nout, exact_st=exact_st)

    out2 = pl.pallas_call(
        kernel,
        out_shape=jax.ShapeDtypeStruct((rows_p, Np), jnp.float32),
        grid_spec=pltpu.PrefetchScalarGridSpec(
            num_scalar_prefetch=0,
            grid=(rows_p // rt,),
            in_specs=[
                pl.BlockSpec((rt, Kp), lambda i: (i, 0)),    # row tile of logits
                pl.BlockSpec((Kp, Np), lambda i: (0, 0)),    # invariant Wn block
            ],
            out_specs=pl.BlockSpec((rt, Np), lambda i: (i, 0)),
        ),
        compiler_params=pltpu.CompilerParams(
            dimension_semantics=("parallel",)),
    )(x2, wn)

    out2 = out2[:rows, :Nout]
    # out.reshape(b, c, n_claster=1, num_classes).sum(dim=-2)
    return out2.reshape(B, C, 1, Nout).sum(axis=-2)


def _reference_forward(logits, W, s, tau=1.0):
    """Pure-JAX reference of the eval forward for verification."""
    xn = logits / jnp.maximum(
        jnp.linalg.norm(logits, axis=-1, keepdims=True), _EPS_NORM)
    wn = W / jnp.maximum(jnp.linalg.norm(W, axis=0, keepdims=True), _EPS_NORM)
    z = (xn @ wn) * s / tau
    y_soft = jax.nn.softmax(z, axis=-1)
    idx = jnp.argmax(y_soft, axis=-1)
    y_hard = jax.nn.one_hot(idx, z.shape[-1], dtype=jnp.float32)
    out = y_hard - y_soft + y_soft
    B, C, N = z.shape
    return out.reshape(B, C, 1, N).sum(axis=-2)


if __name__ == "__main__":
    num_classes = 204        # module default
    n_claster = 1
    B, C = 2, 4              # small batch / channel dims -> rows = 8

    key = jax.random.PRNGKey(0)
    k_w, k_x = jax.random.split(key)

    # Deterministic kaiming_uniform_-style init for W: bound = sqrt(6 / fan_in),
    # fan_in = num_classes * n_claster (W.size(1) for a 2-D tensor).
    fan_in = num_classes * n_claster
    bound = math.sqrt(6.0 / fan_in)
    W = jax.random.uniform(k_w, (num_classes, num_classes * n_claster),
                           minval=-bound, maxval=bound, dtype=jnp.float32)

    s = math.sqrt(2.0) * math.log(num_classes * n_claster)

    logits = jax.random.normal(k_x, (B, C, num_classes), dtype=jnp.float32)

    ref = _reference_forward(logits, W, s, tau=1.0)

    # Fast (default) path: hard one-hot emitted directly.
    out = gumble_softmax_v2_forward(logits, W, s, tau=1.0)
    out = jax.block_until_ready(out)
    assert out.shape == (B, C, num_classes)
    assert np.allclose(np.asarray(out), np.asarray(ref), atol=1e-5, rtol=1e-5)
    assert np.allclose(np.asarray(out).sum(-1), 1.0, atol=1e-4)

    # Exact straight-through arithmetic path (y_hard - y_soft + y_soft).
    out_exact = gumble_softmax_v2_forward(logits, W, s, tau=1.0, exact_st=True)
    out_exact = jax.block_until_ready(out_exact)
    assert np.allclose(np.asarray(out_exact), np.asarray(ref),
                       atol=1e-5, rtol=1e-5)

    print("KERNEL_OK")
</pallas_src>

<mosaic_0001>
module attributes {stable_mosaic.version = 11 : i64} {
  func.func @_gumble_softmax_v2_kernel(%arg0: i32, %arg1: memref<8x256xf32, #tpu.memory_space<vmem>>, %arg2: memref<256x256xf32, #tpu.memory_space<vmem>>, %arg3: memref<8x256xf32, #tpu.memory_space<vmem>>) attributes {dimension_semantics = [#tpu.dimension_semantics<parallel>], iteration_bounds = array<i64: 1>, scalar_prefetch = 0 : i64, scratch_operands = 0 : i64, tpu.core_type = #tpu.core_type<tc>, window_params = [{transform_indices = @transform_0, window_bounds = array<i64: 8, 256>}, {pipeline_mode = #tpu.pipeline_mode<synchronous>, transform_indices = @transform_1, window_bounds = array<i64: 256, 256>}, {transform_indices = @transform_2, window_bounds = array<i64: 8, 256>}]} {
    %c0 = arith.constant 0 : index
    %c0_0 = arith.constant 0 : index
    %0 = vector.load %arg1[%c0, %c0_0] : memref<8x256xf32, #tpu.memory_space<vmem>>, vector<8x256xf32>
    %1 = arith.mulf %0, %0 : vector<8x256xf32>
    %cst = arith.constant dense<0.000000e+00> : vector<8xf32>
    %2 = vector.multi_reduction <add>, %1, %cst [1] : vector<8x256xf32> to vector<8xf32>
    %3 = vector.shape_cast %2 : vector<8xf32> to vector<8x1xf32>
    %cst_1 = arith.constant 1.000000e-24 : f32
    %4 = vector.broadcast %cst_1 : f32 to vector<8x1xf32>
    %5 = arith.maximumf %3, %4 : vector<8x1xf32>
    %6 = math.rsqrt %5 : vector<8x1xf32>
    %7 = vector.broadcast %6 : vector<8x1xf32> to vector<8x256xf32>
    %8 = arith.mulf %0, %7 : vector<8x256xf32>
    %c0_2 = arith.constant 0 : index
    %c0_3 = arith.constant 0 : index
    %9 = vector.load %arg2[%c0_2, %c0_3] : memref<256x256xf32, #tpu.memory_space<vmem>>, vector<256x256xf32>
    %cst_4 = arith.constant dense<0.000000e+00> : vector<8x256xf32>
    %10 = tpu.matmul %8, %9, %cst_4 {dimension_numbers = #tpu.dot_dimension_numbers<[1], [0], [0], [1], [0, 0, 1, 1], [], []>} : vector<8x256xf32>, vector<256x256xf32>, vector<8x256xf32> -> vector<8x256xf32>
    %11 = tpu.iota {dimensions = array<i32: 1>} : vector<8x256xi32>
    %c204_i32 = arith.constant 204 : i32
    %12 = vector.broadcast %c204_i32 : i32 to vector<8x256xi32>
    %13 = arith.cmpi slt, %11, %12 : vector<8x256xi32>
    %cst_5 = arith.constant 0xFF800000 : f32
    %14 = vector.broadcast %cst_5 : f32 to vector<8x256xf32>
    %15 = arith.select %13, %10, %14 : vector<8x256xi1>, vector<8x256xf32>
    %cst_6 = arith.constant dense<0xFF800000> : vector<8xf32>
    %16 = vector.multi_reduction <maximumf>, %15, %cst_6 [1] : vector<8x256xf32> to vector<8xf32>
    %17 = vector.shape_cast %16 : vector<8xf32> to vector<8x1xf32>
    %18 = vector.broadcast %17 : vector<8x1xf32> to vector<8x256xf32>
    %19 = arith.cmpf oeq, %15, %18 : vector<8x256xf32>
    %c256_i32 = arith.constant 256 : i32
    %20 = vector.broadcast %c256_i32 : i32 to vector<8x256xi32>
    %21 = arith.select %19, %11, %20 : vector<8x256xi1>, vector<8x256xi32>
    %cst_7 = arith.constant dense<2147483647> : vector<8xi32>
    %22 = vector.multi_reduction <minsi>, %21, %cst_7 [1] : vector<8x256xi32> to vector<8xi32>
    %23 = vector.shape_cast %22 : vector<8xi32> to vector<8x1xi32>
    %24 = vector.broadcast %23 : vector<8x1xi32> to vector<8x256xi32>
    %25 = arith.cmpi eq, %11, %24 : vector<8x256xi32>
    %26 = arith.extui %25 : vector<8x256xi1> to vector<8x256xi32>
    %27 = arith.sitofp %26 : vector<8x256xi32> to vector<8x256xf32>
    %c0_8 = arith.constant 0 : index
    %c0_9 = arith.constant 0 : index
    %28 = vector.load %arg3[%c0_8, %c0_9] : memref<8x256xf32, #tpu.memory_space<vmem>>, vector<8x256xf32>
    tpu.vector_store %arg3[%c0_8, %c0_9], %27 {strides = array<i32>} : memref<8x256xf32, #tpu.memory_space<vmem>>, vector<8x256xf32>,
    return
  }
  func.func @transform_0(%arg0: i32) -> (i32, i32) {
    %c0_i32 = arith.constant 0 : i32
    %c0_i32_0 = arith.constant 0 : i32
    return %arg0, %c0_i32 : i32, i32
  }
  func.func @transform_1(%arg0: i32) -> (i32, i32) {
    %c0_i32 = arith.constant 0 : i32
    %c0_i32_0 = arith.constant 0 : i32
    %c0_i32_1 = arith.constant 0 : i32
    return %c0_i32, %c0_i32_0 : i32, i32
  }
  func.func @transform_2(%arg0: i32) -> (i32, i32) {
    %c0_i32 = arith.constant 0 : i32
    %c0_i32_0 = arith.constant 0 : i32
    return %arg0, %c0_i32 : i32, i32
  }
}

</mosaic_0001>

<bundles_post_ra>
// kernel: tpu_custom_call.1
= control target key start
LH: loop header
LB: loop body
LE: loop exit
PB: predicated region body
PF: predicated region fallthrough
CT: control target
= control target key end

     0   :  { %7 = vsyncpa [#allocation3], 0  ;;  %s458_s0 = inlined_call_operand.hbm [shape: f32[8,256], index: 0, kind: input, shape index: {}]   ;;  %s459_s1 = inlined_call_operand.hbm [shape: f32[256,256], index: 1, kind: input, shape index: {}]   ;;  %s460_s2 = inlined_call_operand.hbm [shape: f32[8,256], index: 2, kind: output, shape index: {}]  }
   0x1   :  { %8 = vsyncpa [#allocation6], 0 }
   0x2   :  { %9 = vsyncpa [#allocation4], 0  ;;  %s384_s9 = smov [#allocation2]   ;;  %s385_s11 = smov [#allocation5]  }
   0x3   :  { %s16_s10 = sshll.u32 %s384_s9, 4  ;;  %s25_s12 = sshll.u32 %s385_s11, 4  ;;  %s17_s10 = int_to_ptr.vmem [resolvable:$true] %s16_s10  ;;  %s405_s12 = int_to_ptr.vmem [resolvable:$true] %s25_s12 }
   0x4   :  { %s312_s15 = scalar_lea.hbm %s458_s0, 256 }
   0x5   :  { %p313_p0 = scmp.ne.s32.totalorder %s458_s0, %s312_s15  ;;  %p316_p1 = scmp.lt.u32.totalorder %s312_s15, %s458_s0 }
   0x7   :  { %p318_p2 = pnand %p316_p1, %p313_p0 }
   0x9   :  { %321 = shalt.err (!%p318_p2)
}
   0xa   :  { %s322_s20 = scalar_lea.vmem %s17_s10, 256  ;;  %p327_p4 = scmp.lt.s32.totalorder %s17_s10, %s17_s10 }
   0xb   :  { %p323_p3 = scmp.ne.s32.totalorder %s17_s10, %s322_s20  ;;  %p328_p5 = scmp.lt.s32.totalorder %s322_s20, %s322_s20 }
   0xd   :  { %p329_p6 = por %p328_p5, %p327_p4 }
   0xf   :  { %p330_p7 = pnand %p329_p6, %p323_p3 }
  0x11   :  { %333 = shalt.err (!%p330_p7)
}
  0x12   :  { %19 = dma.hbm_to_vmem [thread:$0]  %s458_s0, 256, %s17_s10, [#allocation3]  }
  0x13   :  { %s334_s25 = scalar_lea.hbm %s459_s1, 8192 }
  0x14   :  { %p335_p8 = scmp.ne.s32.totalorder %s459_s1, %s334_s25  ;;  %p338_p9 = scmp.lt.u32.totalorder %s334_s25, %s459_s1 }
  0x16   :  { %p340_p10 = pnand %p338_p9, %p335_p8 }
  0x18   :  { %343 = shalt.err (!%p340_p10)
}
  0x19   :  { %s344_s30 = scalar_lea.vmem %s405_s12, 8192  ;;  %p349_p12 = scmp.lt.s32.totalorder %s405_s12, %s405_s12 }
  0x1a   :  { %p345_p11 = scmp.ne.s32.totalorder %s405_s12, %s344_s30  ;;  %p350_p13 = scmp.lt.s32.totalorder %s344_s30, %s344_s30 }
  0x1c   :  { %p351_p0 = por %p350_p13, %p349_p12 }
  0x1e   :  { %p352_p1 = pnand %p351_p0, %p345_p11 }
  0x20   :  { %355 = shalt.err (!%p352_p1)
}
  0x21   :  { %s386_s0 = smov 256   ;;  %s387_s3 = smov 16  }
  0x22   :  { %31 = dma.hbm_to_vmem [thread:$0]  %s459_s1, 8192, %s405_s12, [#allocation6], %s386_s0, %s386_s0, %s387_s3  }
  0x23   :  { %378 = dma.done.wait [#allocation3], 256  }
  0x24   :  { %379 = vsyncadd [#allocation3], 4294967040 }
  0x25   :  { %380 = dma.done.wait [#allocation6], 8192  }
  0x26   :  { %381 = vsyncadd [#allocation6], 4294959104  ;;  %v436_v0 = vld [vmem:[#allocation2] sm:$0xff]  ;;  %v438_v1 = vld [vmem:[#allocation2 + $0x8] sm:$0xff]  ;;  %s388_s1 = smov [#allocation7]  }
  0x27   :  { %v50_v2 = vld [vmem:[#allocation5 + $0x8] sm:$0xff]  ;;  %v40_v3 = vmul.f32 %v436_v0, %v436_v0  ;;  %v41_v4 = vmul.f32 %v438_v1, %v438_v1  ;;  %v52_v5 = vld [vmem:[#allocation5 + $0x18] sm:$0xff]  ;;  %v49_v6 = vld [vmem:[#allocation5] sm:$0xff]  ;;  %s228_s6 = sshll.u32 %s388_s1, 4  ;;  %s229_s6 = int_to_ptr.vmem [resolvable:$true] %s228_s6 }
  0x28   :  { %v51_v7 = vld [vmem:[#allocation5 + $0x10] sm:$0xff]  ;;  %v240_v8 = vpack.c.bf16 %v52_v5, %v50_v2  ;;  %v54_v10 = vld [vmem:[#allocation5 + $0x28] sm:$0xff]  ;;  %v56_v11 = vld [vmem:[#allocation5 + $0x38] sm:$0xff]  ;;  %s356_s7 = scalar_lea.vmem %s229_s6, 256  ;;  %p361_p3 = scmp.lt.s32.totalorder %s229_s6, %s229_s6 }
  0x29   :  { %v242_v9 = vpack.c.bf16 %v51_v7, %v49_v6  ;;  %v53_v12 = vld [vmem:[#allocation5 + $0x20] sm:$0xff]  ;;  %v42_v13 = vadd.f32 %v41_v4, %v40_v3  ;;  %v244_v14 = vpack.c.bf16 %v56_v11, %v54_v10  ;;  %v55_v15 = vld [vmem:[#allocation5 + $0x30] sm:$0xff]  ;;  %v58_v16 = vld [vmem:[#allocation5 + $0x48] sm:$0xff]  ;;  %p357_p2 = scmp.ne.s32.totalorder %s229_s6, %s356_s7  ;;  %p362_p4 = scmp.lt.s32.totalorder %s356_s7, %s356_s7 }
  0x2a   :  { %v60_v17 = vld [vmem:[#allocation5 + $0x58] sm:$0xff]  ;;  %241 = vmatprep.subr.bf16.mxu0 %v240_v8  ;;  %v246_v18 = vpack.c.bf16 %v55_v15, %v53_v12  ;;  %v57_v20 = vld [vmem:[#allocation5 + $0x40] sm:$0xff]  ;;  %v59_v21 = vld [vmem:[#allocation5 + $0x50] sm:$0xff] }
  0x2b   :  { %43 = vadd.xlane.f32.xlu0 %v42_v13  ;;  %243 = vmatpush1.bf16.msra.mxu0 %v242_v9  ;;  %v248_v19 = vpack.c.bf16 %v60_v17, %v58_v16  ;;  %v62_v22 = vld [vmem:[#allocation5 + $0x68] sm:$0xff]  ;;  %v64_v23 = vld [vmem:[#allocation5 + $0x78] sm:$0xff]  ;;  %v250_v24 = vpack.c.bf16 %v59_v21, %v57_v20  ;;  %v61_v26 = vld [vmem:[#allocation5 + $0x60] sm:$0xff]  ;;  %p363_p5 = por %p362_p4, %p361_p3 }
  0x2c   :  { %245 = vmatprep.subr.bf16.mxu0 %v244_v14  ;;  %v252_v25 = vpack.c.bf16 %v64_v23, %v62_v22  ;;  %v63_v27 = vld [vmem:[#allocation5 + $0x70] sm:$0xff]  ;;  %v66_v28 = vld [vmem:[#allocation5 + $0x88] sm:$0xff]  ;;  %v68_v29 = vld [vmem:[#allocation5 + $0x98] sm:$0xff] }
  0x2d   :  { %v254_v30 = vpack.c.bf16 %v63_v27, %v61_v26  ;;  %v256_v31 = vpack.c.bf16 %v68_v29, %v66_v28  ;;  %v65_v32 = vld [vmem:[#allocation5 + $0x80] sm:$0xff]  ;;  %v67_v33 = vld [vmem:[#allocation5 + $0x90] sm:$0xff]  ;;  %v70_v34 = vld [vmem:[#allocation5 + $0xa8] sm:$0xff]  ;;  %p364_p6 = pnand %p363_p5, %p357_p2 }
  0x2e   :  { %v72_v35 = vld [vmem:[#allocation5 + $0xb8] sm:$0xff]  ;;  %v258_v36 = vpack.c.bf16 %v67_v33, %v65_v32  ;;  %v69_v38 = vld [vmem:[#allocation5 + $0xa0] sm:$0xff]  ;;  %v71_v39 = vld [vmem:[#allocation5 + $0xb0] sm:$0xff] }
  0x2f   :  { %247 = vmatpush1.bf16.msra.mxu0 %v246_v18  ;;  %v260_v37 = vpack.c.bf16 %v72_v35, %v70_v34  ;;  %v74_v40 = vld [vmem:[#allocation5 + $0xc8] sm:$0xff]  ;;  %v76_v41 = vld [vmem:[#allocation5 + $0xd8] sm:$0xff]  ;;  %v262_v42 = vpack.c.bf16 %v71_v39, %v69_v38  ;;  %v73_v44 = vld [vmem:[#allocation5 + $0xc0] sm:$0xff] }
  0x30   :  { %249 = vmatprep.subr.bf16.mxu0 %v248_v19  ;;  %v264_v43 = vpack.c.bf16 %v76_v41, %v74_v40  ;;  %v75_v45 = vld [vmem:[#allocation5 + $0xd0] sm:$0xff]  ;;  %v78_v46 = vld [vmem:[#allocation5 + $0xe8] sm:$0xff]  ;;  %v80_v47 = vld [vmem:[#allocation5 + $0xf8] sm:$0xff] }
  0x31   :  { %v266_v48 = vpack.c.bf16 %v75_v45, %v73_v44  ;;  %v268_v49 = vpack.c.bf16 %v80_v47, %v78_v46  ;;  %v77_v50 = vld [vmem:[#allocation5 + $0xe0] sm:$0xff]  ;;  %v79_v51 = vld [vmem:[#allocation5 + $0xf0] sm:$0xff]  ;;  %v82_v52 = vld [vmem:[#allocation5 + $0x108] sm:$0xff]  ;;  %v184_v44 = vlaneseq }
  0x32   :  { %v84_v53 = vld [vmem:[#allocation5 + $0x118] sm:$0xff]  ;;  %v270_v54 = vpack.c.bf16 %v79_v51, %v77_v50  ;;  %v81_v56 = vld [vmem:[#allocation5 + $0x100] sm:$0xff]  ;;  %v83_v57 = vld [vmem:[#allocation5 + $0x110] sm:$0xff] }
  0x33   :  { %251 = vmatpush1.bf16.msra.mxu0 %v250_v24  ;;  %v272_v55 = vpack.c.bf16 %v84_v53, %v82_v52  ;;  %v86_v58 = vld [vmem:[#allocation5 + $0x128] sm:$0xff]  ;;  %v88_v59 = vld [vmem:[#allocation5 + $0x138] sm:$0xff]  ;;  %v274_v60 = vpack.c.bf16 %v83_v57, %v81_v56  ;;  %v85_v62 = vld [vmem:[#allocation5 + $0x120] sm:$0xff]  ;;  %v185_v45 = vand.u32 127, %v184_v44 }
  0x34   :  { %253 = vmatprep.subr.bf16.mxu0 %v252_v25  ;;  %v276_v61 = vpack.c.bf16 %v88_v59, %v86_v58  ;;  %v87_v63 = vld [vmem:[#allocation5 + $0x130] sm:$0xff]  ;;  %v90_v2 = vld [vmem:[#allocation5 + $0x148] sm:$0xff]  ;;  %v92_v3 = vld [vmem:[#allocation5 + $0x158] sm:$0xff] }
  0x35   :  { %v278_v4 = vpack.c.bf16 %v87_v63, %v85_v62  ;;  %v280_v5 = vpack.c.bf16 %v92_v3, %v90_v2  ;;  %v89_v6 = vld [vmem:[#allocation5 + $0x140] sm:$0xff]  ;;  %v91_v7 = vld [vmem:[#allocation5 + $0x150] sm:$0xff]  ;;  %v94_v8 = vld [vmem:[#allocation5 + $0x168] sm:$0xff]  ;;  %v186_v46 = vadd.s32 128, %v185_v45  ;;  %v389_v2 = vmov 0.0  }
  0x36   :  { %v96_v9 = vld [vmem:[#allocation5 + $0x178] sm:$0xff]  ;;  %v282_v10 = vpack.c.bf16 %v91_v7, %v89_v6  ;;  %v93_v12 = vld [vmem:[#allocation5 + $0x160] sm:$0xff]  ;;  %v95_v13 = vld [vmem:[#allocation5 + $0x170] sm:$0xff] }
  0x37   :  { %255 = vmatpush1.bf16.msra.mxu0 %v254_v30  ;;  %v284_v11 = vpack.c.bf16 %v96_v9, %v94_v8  ;;  %v98_v14 = vld [vmem:[#allocation5 + $0x188] sm:$0xff]  ;;  %v100_v15 = vld [vmem:[#allocation5 + $0x198] sm:$0xff]  ;;  %v286_v16 = vpack.c.bf16 %v95_v13, %v93_v12  ;;  %v97_v18 = vld [vmem:[#allocation5 + $0x180] sm:$0xff]  ;;  %vm188_vm0 = vcmp.lt.s32.totalorder %v186_v46, 204 }
  0x38   :  { %257 = vmatprep.subr.bf16.mxu0 %v256_v31  ;;  %v288_v17 = vpack.c.bf16 %v100_v15, %v98_v14  ;;  %v99_v19 = vld [vmem:[#allocation5 + $0x190] sm:$0xff]  ;;  %v102_v20 = vld [vmem:[#allocation5 + $0x1a8] sm:$0xff]  ;;  %v104_v21 = vld [vmem:[#allocation5 + $0x1b8] sm:$0xff] }
  0x39   :  { %v290_v22 = vpack.c.bf16 %v99_v19, %v97_v18  ;;  %v292_v23 = vpack.c.bf16 %v104_v21, %v102_v20  ;;  %v101_v24 = vld [vmem:[#allocation5 + $0x1a0] sm:$0xff]  ;;  %v103_v25 = vld [vmem:[#allocation5 + $0x1b0] sm:$0xff]  ;;  %v106_v26 = vld [vmem:[#allocation5 + $0x1c8] sm:$0xff] }
  0x3a   :  { %v108_v27 = vld [vmem:[#allocation5 + $0x1d8] sm:$0xff]  ;;  %v294_v28 = vpack.c.bf16 %v103_v25, %v101_v24  ;;  %v105_v30 = vld [vmem:[#allocation5 + $0x1c0] sm:$0xff]  ;;  %v107_v31 = vld [vmem:[#allocation5 + $0x1d0] sm:$0xff] }
  0x3b   :  { %259 = vmatpush1.bf16.msra.mxu0 %v258_v36  ;;  %v296_v29 = vpack.c.bf16 %v108_v27, %v106_v26  ;;  %v110_v32 = vld [vmem:[#allocation5 + $0x1e8] sm:$0xff]  ;;  %v112_v33 = vld [vmem:[#allocation5 + $0x1f8] sm:$0xff]  ;;  %v298_v34 = vpack.c.bf16 %v107_v31, %v105_v30  ;;  %v109_v36 = vld [vmem:[#allocation5 + $0x1e0] sm:$0xff] }
  0x3c   :  { %261 = vmatprep.subr.bf16.mxu0 %v260_v37  ;;  %v300_v35 = vpack.c.bf16 %v112_v33, %v110_v32  ;;  %v111_v37 = vld [vmem:[#allocation5 + $0x1f0] sm:$0xff] }
  0x3d   :  { %v302_v38 = vpack.c.bf16 %v111_v37, %v109_v36 }
  0x3f   :  { %263 = vmatpush1.bf16.msra.mxu0 %v262_v42 }
  0x40   :  { %265 = vmatprep.subr.bf16.mxu0 %v264_v43 }
  0x43   :  { %267 = vmatpush1.bf16.msra.mxu0 %v266_v48 }
  0x44   :  { %269 = vmatprep.subr.bf16.mxu0 %v268_v49 }
  0x47   :  { %271 = vmatpush1.bf16.msra.mxu0 %v270_v54 }
  0x48   :  { %273 = vmatprep.subr.bf16.mxu0 %v272_v55 }
  0x4b   :  { %275 = vmatpush1.bf16.msra.mxu0 %v274_v60 }
  0x4c   :  { %277 = vmatprep.subr.bf16.mxu0 %v276_v61 }
  0x4f   :  { %279 = vmatpush1.bf16.msra.mxu0 %v278_v4 }
  0x50   :  { %281 = vmatprep.subr.bf16.mxu0 %v280_v5 }
  0x53   :  { %283 = vmatpush1.bf16.msra.mxu0 %v282_v10 }
  0x54   :  { %285 = vmatprep.subr.bf16.mxu0 %v284_v11 }
  0x57   :  { %287 = vmatpush1.bf16.msra.mxu0 %v286_v16 }
  0x58   :  { %289 = vmatprep.subr.bf16.mxu0 %v288_v17 }
  0x5b   :  { %291 = vmatpush1.bf16.msra.mxu0 %v290_v22 }
  0x5c   :  { %293 = vmatprep.subr.bf16.mxu0 %v292_v23 }
  0x5f   :  { %295 = vmatpush1.bf16.msra.mxu0 %v294_v28 }
  0x60   :  { %297 = vmatprep.subr.bf16.mxu0 %v296_v29 }
  0x63   :  { %299 = vmatpush1.bf16.msra.mxu0 %v298_v34 }
  0x64   :  { %301 = vmatprep.subr.bf16.mxu0 %v300_v35 }
  0x67   :  { %303 = vmatpush1.bf16.msra.mxu0 %v302_v38 }
  0xb8   :  { %v44_v39 = vpop.xlane.xlu0 %43 }
  0xb9   :  { %v45_v40 = vmax.f32 %v44_v39, 1e-24 }
  0xbb   :  { %310 = vrsqrt.f32 %v45_v40 }
  0xc5   :  { %v311_v41 = vpop.eup %310 }
  0xc6   :  { %v48_v42 = vmul.f32 %v311_v41, %v438_v1  ;;  %v47_v43 = vmul.f32 %v311_v41, %v436_v0 }
  0xc8   :  { %177 = vmatprep.mubr.f32.mxu0 %v48_v42 }
  0xc9   :  { %178 = vmatmul.mubr.f32.vlgmr.msra.gmra.mrb[0].mxu0 %v47_v43 }
 0x19c   :  { %v179_v47 = vpop.f32.mrb[0].mxu0 }
 0x19d   :  { %v181_v48 = vpop.f32.mrb[1].mxu0 }
 0x19e   :  { %v190_v49 = vsel %vm188_vm0, %v181_v48, -inf }
 0x19f   :  { %v191_v50 = vmax.f32 %v179_v47, %v190_v49 }
 0x1a1   :  { %192 = vmax.xlane.f32.xlu0 %v191_v50 }
 0x22e   :  { %v193_v51 = vpop.xlane.xlu0 %192 }
 0x22f   :  { %vm194_vm1 = vcmp.eq.f32.partialorder %v179_v47, %v193_v51  ;;  %vm195_vm2 = vcmp.eq.f32.partialorder %v190_v49, %v193_v51 }
 0x230   :  { %v196_v52 = vsel %vm194_vm1, %v185_v45, 256  ;;  %v197_v53 = vsel %vm195_vm2, %v186_v46, 256 }
 0x231   :  { %vm198_vm3 = vcmp.lt.s32.totalorder %v196_v52, %v197_v53 }
 0x232   :  { %v199_v1 = vsel %vm198_vm3, %v196_v52, %v197_v53 }
 0x233   :  { %v201_v54 = vshra.s32 %v199_v1, 16  ;;  %v200_v55 = vand.u32 65535, %v199_v1 }
 0x235   :  { %v203_v0 = vcvt.s32.f32 %v201_v54  ;;  %v202_v57 = vcvt.s32.f32 %v200_v55 }
 0x237   :  { %204 = vmin.xlane.f32.xlu1 %v203_v0 }
 0x2c4   :  { %v205_v56 = vpop.xlane.xlu1 %204 }
 0x2c5   :  { %vm206_vm4 = vcmp.eq.f32.partialorder %v203_v0, %v205_v56  ;;  %v211_v59 = vcvt.f32.s32 %v205_v56 }
 0x2c6   :  { %v207_v58 = vsel %vm206_vm4, %v202_v57, inf }
 0x2c7   :  { %208 = vmin.xlane.f32.xlu1 %v207_v58  ;;  %v212_v61 = vshll.u32 %v211_v59, 16 }
 0x354   :  { %v209_v60 = vpop.xlane.xlu1 %208 }
 0x355   :  { %v210_v62 = vcvt.f32.s32 %v209_v60 }
 0x357   :  { %v213_v63 = vadd.s32 %v212_v61, %v210_v62 }
 0x359   :  { %vm214_vm5 = vcmp.eq.s32.totalorder %v185_v45, %v213_v63  ;;  %vm215_vm6 = vcmp.eq.s32.totalorder %v186_v46, %v213_v63 }
 0x35a   :  { %v238_v3 = vsel %vm214_vm5, 1.0, %v389_v2  ;;  %v239_v4 = vsel %vm215_vm6, 1.0, %v389_v2 }
 0x35b   :  { %220 = vst [vmem:[#allocation7] sm:$0xff] %v238_v3  ;;  %221 = vst [vmem:[#allocation7 + $0x8] sm:$0xff] %v239_v4 }
 0x35c   :  { %367 = shalt.err (!%p364_p6)
}
 0x35d   :  { %s368_s10 = scalar_lea.hbm %s460_s2, 256 }
 0x35e   :  { %p369_p7 = scmp.ne.s32.totalorder %s460_s2, %s368_s10  ;;  %p372_p8 = scmp.lt.u32.totalorder %s368_s10, %s460_s2 }
 0x360   :  { %p374_p9 = pnand %p372_p8, %p369_p7 }
 0x362   :  { %377 = shalt.err (!%p374_p9)
}
 0x363   :  { %231 = dma.vmem_to_hbm [thread:$0]  %s229_s6, 256, %s460_s2, [#allocation4]  }
 0x364   :  { %382 = dma.done.wait [#allocation4], 256  }
 0x365   :  { %383 = vsyncadd [#allocation4], 4294967040 }
 0x366   :  { %235 = vsyncpa [#allocation3], 1 }
 0x367   :  { %236 = vsyncpa [#allocation6], 1 }
 0x368   :  { %237 = vsyncpa [#allocation4], 1 }

</bundles_post_ra>
